<compile_context>
chip_gen: v7x
topology: tpu7x:2x2x1
jax: 0.10.0
libtpu: 0.0.40
codegen_flags: <defaults>
</compile_context>

<pallas_src>
import jax
import jax.numpy as jnp
from jax.experimental import pallas as pl
from jax.experimental.pallas import tpu as pltpu


def _round_up(x, m):
    return (x + m - 1) // m * m


def _pick_block(total, target, align):
    """Largest multiple of `align` that divides `total` and is <= target."""
    best = align
    d = align
    limit = min(target, total)
    while d <= limit:
        if total % d == 0:
            best = d
        d += align
    return best


def _vmem_capacity_bytes():
    try:
        return int(pltpu.get_tpu_info().vmem_capacity_bytes)
    except Exception:
        return 64 << 20  # conservative: v7x per-TensorCore VMEM


# ---------------------------------------------------------------------------
# Kernels
# ---------------------------------------------------------------------------

def mlp_kernel_resident(x_ref, w1_ref, b1_ref, w2_ref, b2_ref, o_ref):
    """Full MLP for one batch tile; W1^T / W2^T resident in VMEM (DMA'd once)."""
    # 1st matmul on the MXU: [bm, Din_p] @ [Din_p, H_p] -> f32.
    hidden = jnp.dot(x_ref[...], w1_ref[...],
                     preferred_element_type=jnp.float32)
    # Bias + ReLU on the f32 intermediate (VPU).
    hidden = jnp.maximum(hidden + b1_ref[...].astype(jnp.float32), 0.0)
    # 2nd matmul: cast activation to the weight (compute) dtype for the MXU,
    # accumulate in f32.
    out = jnp.dot(hidden.astype(w2_ref.dtype), w2_ref[...],
                  preferred_element_type=jnp.float32)
    o_ref[...] = (out + b2_ref[...].astype(jnp.float32)).astype(o_ref.dtype)


def mlp_kernel_tiled(x_ref, w1_ref, b1_ref, w2_ref, b2_ref, o_ref, acc_ref):
    """One (batch-tile, hidden-tile) step; hidden axis is the reduction."""
    h_idx = pl.program_id(1)

    hidden = jnp.dot(x_ref[...], w1_ref[...],
                     preferred_element_type=jnp.float32)
    hidden = jnp.maximum(hidden + b1_ref[...].astype(jnp.float32), 0.0)
    partial = jnp.dot(hidden.astype(w2_ref.dtype), w2_ref[...],
                      preferred_element_type=jnp.float32)

    @pl.when(h_idx == 0)
    def _first():        # no explicit zero-init pass: write, don't add
        acc_ref[...] = partial

    @pl.when(h_idx != 0)
    def _rest():
        acc_ref[...] += partial

    @pl.when(h_idx == pl.num_programs(1) - 1)
    def _finalize():
        o_ref[...] = (acc_ref[...]
                      + b2_ref[...].astype(jnp.float32)).astype(o_ref.dtype)


# ---------------------------------------------------------------------------
# Wrapper
# ---------------------------------------------------------------------------

def prepare_mlp_params(w1, b1, w2, b2, *, compute_dtype=jnp.bfloat16):
    """One-time layout prep (transpose + pad + cast). Hoist out of the call path."""
    H, D_in = w1.shape
    D_out, H2 = w2.shape
    assert H2 == H

    D_in_p = _round_up(D_in, 128)
    H_p = _round_up(H, 128)
    D_out_p = _round_up(D_out, 128)

    w1t = jnp.pad(w1.T, ((0, D_in_p - D_in), (0, H_p - H))).astype(compute_dtype)
    w2t = jnp.pad(w2.T, ((0, H_p - H), (0, D_out_p - D_out))).astype(compute_dtype)
    # Biases stay f32 (epilogue precision), padded lane-dense.
    b1p = jnp.pad(b1.reshape(1, H).astype(jnp.float32), ((0, 0), (0, H_p - H)))
    b2p = jnp.pad(b2.reshape(1, D_out).astype(jnp.float32),
                  ((0, 0), (0, D_out_p - D_out)))
    return {"w1t": w1t, "b1p": b1p, "w2t": w2t, "b2p": b2p,
            "dims": (D_in, H, D_out)}


def mlp_forward_prepared(x, params, *, block_m=None):
    """relu(x @ W1^T + b1) @ W2^T + b2 with pre-prepared (padded) weights."""
    w1t, b1p, w2t, b2p = params["w1t"], params["b1p"], params["w2t"], params["b2p"]
    D_in, H, D_out = params["dims"]
    B, d = x.shape
    assert d == D_in

    D_in_p, H_p = w1t.shape
    _, D_out_p = w2t.shape
    compute_dtype = w1t.dtype
    out_dtype = x.dtype

    c_item = jnp.dtype(compute_dtype).itemsize
    o_item = jnp.dtype(out_dtype).itemsize
    sublane = 16 if compute_dtype == jnp.bfloat16 else 8

    # ---- batch tiling ----------------------------------------------------
    if block_m is None:
        block_m = 512
    block_m = min(block_m, _round_up(B, sublane))
    block_m = _round_up(block_m, sublane)
    # v7x megacore: prefer >= 2 batch tiles when the batch is big enough so the
    # "parallel" axis actually splits across both TensorCores.
    if B >= 2 * sublane and pl.cdiv(B, block_m) < 2:
        block_m = _round_up(pl.cdiv(B, 2), sublane)

    # ---- VMEM budget (chip-aware: 64 MiB/TC on v7x, 128 MiB on v5e/v6e) ---
    capacity = _vmem_capacity_bytes()
    budget = max(capacity - (24 << 20), 24 << 20)
    hard_cap = max(capacity - (8 << 20), 32 << 20)

    # Estimated VMEM for the resident-weights path (double-buffer everything,
    # plus f32 hidden intermediate headroom).
    resident_bytes = (2 * block_m * D_in_p * c_item
                      + 2 * D_in_p * H_p * c_item
                      + 2 * H_p * D_out_p * c_item
                      + 2 * block_m * D_out_p * o_item
                      + 2 * block_m * H_p * 4)

    grid0 = None  # set below

    if resident_bytes <= budget:
        # ---------------- resident-weights fast path ----------------------
        B_p = _round_up(B, block_m)
        xp = jnp.pad(x.astype(compute_dtype),
                     ((0, B_p - B), (0, D_in_p - D_in)))
        grid0 = B_p // block_m

        vmem_limit = int(min(max(resident_bytes + (4 << 20), 32 << 20), hard_cap))
        cost = pl.CostEstimate(
            flops=2 * B_p * (D_in_p * H_p + H_p * D_out_p),
            transcendentals=0,
            bytes_accessed=(xp.size * c_item
                            + (w1t.size + w2t.size) * c_item      # once total
                            + (b1p.size + b2p.size) * 4
                            + B_p * D_out_p * o_item),
        )

        out = pl.pallas_call(
            mlp_kernel_resident,
            out_shape=jax.ShapeDtypeStruct((B_p, D_out_p), out_dtype),
            grid_spec=pl.GridSpec(
                grid=(grid0,),
                in_specs=[
                    pl.BlockSpec((block_m, D_in_p), lambda i: (i, 0)),  # x tile
                    pl.BlockSpec((D_in_p, H_p), lambda i: (0, 0)),      # W1^T
                    pl.BlockSpec((1, H_p), lambda i: (0, 0)),           # b1
                    pl.BlockSpec((H_p, D_out_p), lambda i: (0, 0)),     # W2^T
                    pl.BlockSpec((1, D_out_p), lambda i: (0, 0)),       # b2
                ],
                out_specs=pl.BlockSpec((block_m, D_out_p), lambda i: (i, 0)),
            ),
            compiler_params=pltpu.CompilerParams(
                dimension_semantics=("parallel",),
                vmem_limit_bytes=vmem_limit,
            ),
            cost_estimate=cost,
        )(xp, w1t, b1p, w2t, b2p)

    else:
        # ---------------- tiled-H fallback (very wide hidden) -------------
        def tile_bytes(bm, bh):
            return (2 * bm * D_in_p * c_item
                    + 2 * D_in_p * bh * c_item
                    + 2 * bh * D_out_p * c_item
                    + 2 * bm * D_out_p * o_item
                    + bm * D_out_p * 4          # f32 accumulator scratch
                    + 2 * bm * bh * 4)          # f32 hidden intermediate

        block_h = _pick_block(H_p, 2048, 128)
        while tile_bytes(block_m, block_h) > budget and block_h > 128:
            block_h = _pick_block(H_p, block_h - 128, 128)
        while tile_bytes(block_m, block_h) > budget and block_m > sublane:
            block_m = max(sublane, _round_up(block_m // 2, sublane))
        # TODO(synk): for extremely wide D_in / D_out (>~8K) also tile those
        # axes; they are kept untiled here (fine for typical MLP widths).

        B_p = _round_up(B, block_m)
        xp = jnp.pad(x.astype(compute_dtype),
                     ((0, B_p - B), (0, D_in_p - D_in)))
        grid0 = B_p // block_m
        n_h = H_p // block_h

        vmem_limit = int(min(max(tile_bytes(block_m, block_h) + (4 << 20),
                                 32 << 20), hard_cap))
        cost = pl.CostEstimate(
            flops=2 * B_p * (D_in_p * H_p + H_p * D_out_p),
            transcendentals=0,
            # weights are re-streamed once per batch tile in this layout
            bytes_accessed=(xp.size * c_item
                            + grid0 * (w1t.size + w2t.size) * c_item
                            + grid0 * (b1p.size + b2p.size) * 4
                            + B_p * D_out_p * o_item),
        )

        out = pl.pallas_call(
            mlp_kernel_tiled,
            out_shape=jax.ShapeDtypeStruct((B_p, D_out_p), out_dtype),
            grid_spec=pl.GridSpec(
                grid=(grid0, n_h),
                in_specs=[
                    pl.BlockSpec((block_m, D_in_p), lambda i, h: (i, 0)),
                    pl.BlockSpec((D_in_p, block_h), lambda i, h: (0, h)),
                    pl.BlockSpec((1, block_h), lambda i, h: (0, h)),
                    pl.BlockSpec((block_h, D_out_p), lambda i, h: (h, 0)),
                    pl.BlockSpec((1, D_out_p), lambda i, h: (0, 0)),
                ],
                out_specs=pl.BlockSpec((block_m, D_out_p), lambda i, h: (i, 0)),
                scratch_shapes=[pltpu.VMEM((block_m, D_out_p), jnp.float32)],
            ),
            compiler_params=pltpu.CompilerParams(
                dimension_semantics=("parallel", "arbitrary"),
                vmem_limit_bytes=vmem_limit,
            ),
            cost_estimate=cost,
        )(xp, w1t, b1p, w2t, b2p)

    # strip batch / feature padding
    return out[:B, :D_out]


def mlp_forward(x, w1, b1, w2, b2, *, compute_dtype=jnp.bfloat16, block_m=None):
    """Convenience wrapper (prep folds under jit; prefer prepare_mlp_params once)."""
    params = prepare_mlp_params(w1, b1, w2, b2, compute_dtype=compute_dtype)
    return mlp_forward_prepared(x, params, block_m=block_m)


def init_linear(key, out_features, in_features, dtype=jnp.float32):
    # PyTorch nn.Linear default init: U(-1/sqrt(in), 1/sqrt(in))
    kw, kb = jax.random.split(key)
    bound = 1.0 / (in_features ** 0.5)
    w = jax.random.uniform(kw, (out_features, in_features), dtype,
                           minval=-bound, maxval=bound)
    b = jax.random.uniform(kb, (out_features,), dtype,
                           minval=-bound, maxval=bound)
    return w, b


if __name__ == "__main__":
    key = jax.random.PRNGKey(0)
    k_x, k_l1, k_l2 = jax.random.split(key, 3)

    batch = 8
    input_size = 32
    hidden_size = 64
    output_size = 16

    x = jax.random.normal(k_x, (batch, input_size), jnp.float32)
    w1, b1 = init_linear(k_l1, hidden_size, input_size)
    w2, b2 = init_linear(k_l2, output_size, hidden_size)

    # reference in plain JAX (matches the PyTorch forward)
    ref = jnp.maximum(x @ w1.T + b1, 0.0) @ w2.T + b2

    # Exact f32 semantics path.
    params_f32 = prepare_mlp_params(w1, b1, w2, b2, compute_dtype=jnp.float32)
    out_f32 = jax.block_until_ready(mlp_forward_prepared(x, params_f32))
    assert out_f32.shape == (batch, output_size)
    assert jnp.allclose(out_f32, ref, atol=1e-5, rtol=1e-5)

    # Default fast path: bf16 MXU operands, f32 accumulation + epilogue.
    params_bf16 = prepare_mlp_params(w1, b1, w2, b2)   # compute_dtype=bf16
    out_bf16 = jax.block_until_ready(mlp_forward_prepared(x, params_bf16))
    assert out_bf16.shape == (batch, output_size)
    assert jnp.allclose(out_bf16, ref, atol=5e-2, rtol=5e-2)

    print("KERNEL_OK")
</pallas_src>

<mosaic_0001>
module attributes {stable_mosaic.version = 11 : i64} {
  func.func @mlp_kernel_resident(%arg0: i32, %arg1: memref<8x128xf32, #tpu.memory_space<vmem>>, %arg2: memref<128x128xf32, #tpu.memory_space<vmem>>, %arg3: memref<1x128xf32, #tpu.memory_space<vmem>>, %arg4: memref<128x128xf32, #tpu.memory_space<vmem>>, %arg5: memref<1x128xf32, #tpu.memory_space<vmem>>, %arg6: memref<8x128xf32, #tpu.memory_space<vmem>>) attributes {dimension_semantics = [#tpu.dimension_semantics<parallel>], iteration_bounds = array<i64: 1>, scalar_prefetch = 0 : i64, scratch_operands = 0 : i64, tpu.core_type = #tpu.core_type<tc>, window_params = [{transform_indices = @transform_0, window_bounds = array<i64: 8, 128>}, {pipeline_mode = #tpu.pipeline_mode<synchronous>, transform_indices = @transform_1, window_bounds = array<i64: 128, 128>}, {pipeline_mode = #tpu.pipeline_mode<synchronous>, transform_indices = @transform_2, window_bounds = array<i64: 1, 128>}, {pipeline_mode = #tpu.pipeline_mode<synchronous>, transform_indices = @transform_3, window_bounds = array<i64: 128, 128>}, {pipeline_mode = #tpu.pipeline_mode<synchronous>, transform_indices = @transform_4, window_bounds = array<i64: 1, 128>}, {transform_indices = @transform_5, window_bounds = array<i64: 8, 128>}]} {
    %c0 = arith.constant 0 : index
    %c0_0 = arith.constant 0 : index
    %0 = vector.load %arg1[%c0, %c0_0] : memref<8x128xf32, #tpu.memory_space<vmem>>, vector<8x128xf32>
    %c0_1 = arith.constant 0 : index
    %c0_2 = arith.constant 0 : index
    %1 = vector.load %arg2[%c0_1, %c0_2] : memref<128x128xf32, #tpu.memory_space<vmem>>, vector<128x128xf32>
    %cst = arith.constant dense<0.000000e+00> : vector<8x128xf32>
    %2 = tpu.matmul %0, %1, %cst {dimension_numbers = #tpu.dot_dimension_numbers<[1], [0], [0], [1], [0, 0, 1, 1], [], []>} : vector<8x128xf32>, vector<128x128xf32>, vector<8x128xf32> -> vector<8x128xf32>
    %c0_3 = arith.constant 0 : index
    %c0_4 = arith.constant 0 : index
    %3 = vector.load %arg3[%c0_3, %c0_4] : memref<1x128xf32, #tpu.memory_space<vmem>>, vector<1x128xf32>
    %4 = vector.broadcast %3 : vector<1x128xf32> to vector<8x128xf32>
    %5 = arith.addf %2, %4 : vector<8x128xf32>
    %cst_5 = arith.constant 0.000000e+00 : f32
    %6 = vector.broadcast %cst_5 : f32 to vector<8x128xf32>
    %7 = arith.maximumf %5, %6 : vector<8x128xf32>
    %c0_6 = arith.constant 0 : index
    %c0_7 = arith.constant 0 : index
    %8 = vector.load %arg4[%c0_6, %c0_7] : memref<128x128xf32, #tpu.memory_space<vmem>>, vector<128x128xf32>
    %cst_8 = arith.constant dense<0.000000e+00> : vector<8x128xf32>
    %9 = tpu.matmul %7, %8, %cst_8 {dimension_numbers = #tpu.dot_dimension_numbers<[1], [0], [0], [1], [0, 0, 1, 1], [], []>} : vector<8x128xf32>, vector<128x128xf32>, vector<8x128xf32> -> vector<8x128xf32>
    %c0_9 = arith.constant 0 : index
    %c0_10 = arith.constant 0 : index
    %10 = vector.load %arg5[%c0_9, %c0_10] : memref<1x128xf32, #tpu.memory_space<vmem>>, vector<1x128xf32>
    %11 = vector.broadcast %10 : vector<1x128xf32> to vector<8x128xf32>
    %12 = arith.addf %9, %11 : vector<8x128xf32>
    %c0_11 = arith.constant 0 : index
    %c0_12 = arith.constant 0 : index
    %13 = vector.load %arg6[%c0_11, %c0_12] : memref<8x128xf32, #tpu.memory_space<vmem>>, vector<8x128xf32>
    tpu.vector_store %arg6[%c0_11, %c0_12], %12 {strides = array<i32>} : memref<8x128xf32, #tpu.memory_space<vmem>>, vector<8x128xf32>,
    return
  }
  func.func @transform_0(%arg0: i32) -> (i32, i32) {
    %c0_i32 = arith.constant 0 : i32
    %c0_i32_0 = arith.constant 0 : i32
    return %arg0, %c0_i32 : i32, i32
  }
  func.func @transform_1(%arg0: i32) -> (i32, i32) {
    %c0_i32 = arith.constant 0 : i32
    %c0_i32_0 = arith.constant 0 : i32
    %c0_i32_1 = arith.constant 0 : i32
    return %c0_i32, %c0_i32_0 : i32, i32
  }
  func.func @transform_2(%arg0: i32) -> (i32, i32) {
    %c0_i32 = arith.constant 0 : i32
    %c0_i32_0 = arith.constant 0 : i32
    %c0_i32_1 = arith.constant 0 : i32
    return %c0_i32, %c0_i32_0 : i32, i32
  }
  func.func @transform_3(%arg0: i32) -> (i32, i32) {
    %c0_i32 = arith.constant 0 : i32
    %c0_i32_0 = arith.constant 0 : i32
    %c0_i32_1 = arith.constant 0 : i32
    return %c0_i32, %c0_i32_0 : i32, i32
  }
  func.func @transform_4(%arg0: i32) -> (i32, i32) {
    %c0_i32 = arith.constant 0 : i32
    %c0_i32_0 = arith.constant 0 : i32
    %c0_i32_1 = arith.constant 0 : i32
    return %c0_i32, %c0_i32_0 : i32, i32
  }
  func.func @transform_5(%arg0: i32) -> (i32, i32) {
    %c0_i32 = arith.constant 0 : i32
    %c0_i32_0 = arith.constant 0 : i32
    return %arg0, %c0_i32 : i32, i32
  }
}

</mosaic_0001>

<bundles_post_ra>
// kernel: tpu_custom_call.1
= control target key start
LH: loop header
LB: loop body
LE: loop exit
PB: predicated region body
PF: predicated region fallthrough
CT: control target
= control target key end

     0   :  { %10 = vsyncpa [#allocation3], 0  ;;  %s637_s0 = inlined_call_operand.hbm [shape: f32[8,128], index: 0, kind: input, shape index: {}]   ;;  %s638_s1 = inlined_call_operand.hbm [shape: f32[128,128], index: 1, kind: input, shape index: {}]   ;;  %s639_s2 = inlined_call_operand.vmem [shape: f32[1,128], index: 2, kind: input, shape index: {}]   ;;  %s640_s3 = inlined_call_operand.hbm [shape: f32[128,128], index: 3, kind: input, shape index: {}]   ;;  %s641_s4 = inlined_call_operand.vmem [shape: f32[1,128], index: 4, kind: input, shape index: {}]   ;;  %s642_s5 = inlined_call_operand.hbm [shape: f32[8,128], index: 5, kind: output, shape index: {}]  }
   0x1   :  { %11 = vsyncpa [#allocation6], 0 }
   0x2   :  { %12 = vsyncpa [#allocation4], 0  ;;  %s522_s18 = smov [#allocation5]   ;;  %s428_s22 = scalar_lea.hbm %s638_s1, 2048 }
   0x3   :  { %s28_s19 = sshll.u32 %s522_s18, 4  ;;  %p429_p0 = scmp.ne.s32.totalorder %s638_s1, %s428_s22  ;;  %s29_s19 = int_to_ptr.vmem [resolvable:$true] %s28_s19 }
   0x4   :  { %p432_p1 = scmp.lt.u32.totalorder %s428_s22, %s638_s1 }
   0x6   :  { %p434_p2 = pnand %p432_p1, %p429_p0 }
   0x8   :  { %437 = shalt.err (!%p434_p2)
}
   0x9   :  { %s438_s27 = scalar_lea.vmem %s29_s19, 2048  ;;  %p443_p4 = scmp.lt.s32.totalorder %s29_s19, %s29_s19 }
   0xa   :  { %p439_p3 = scmp.ne.s32.totalorder %s29_s19, %s438_s27  ;;  %p444_p5 = scmp.lt.s32.totalorder %s438_s27, %s438_s27 }
   0xc   :  { %p445_p6 = por %p444_p5, %p443_p4 }
   0xe   :  { %p446_p7 = pnand %p445_p6, %p439_p3 }
  0x10   :  { %449 = shalt.err (!%p446_p7)
}
  0x11   :  { %s523_s28 = smov 128   ;;  %s524_s29 = smov 8  }
  0x12   :  { %34 = dma.hbm_to_vmem [thread:$0]  %s638_s1, 2048, %s29_s19, [#allocation6], %s523_s28, %s523_s28, %s524_s29  }
  0x13   :  { %s525_s7 = smov [#allocation2]   ;;  %s526_s9 = smov [#allocation7]  }
  0x14   :  { %s19_s8 = sshll.u32 %s525_s7, 4  ;;  %s42_s10 = sshll.u32 %s526_s9, 4  ;;  %s20_s8 = int_to_ptr.vmem [resolvable:$true] %s19_s8  ;;  %s43_s10 = int_to_ptr.vmem [resolvable:$true] %s42_s10 }
  0x15   :  { %s450_s13 = scalar_lea.hbm %s637_s0, 128 }
  0x16   :  { %p451_p8 = scmp.ne.s32.totalorder %s637_s0, %s450_s13  ;;  %p454_p9 = scmp.lt.u32.totalorder %s450_s13, %s637_s0 }
  0x18   :  { %p456_p10 = pnand %p454_p9, %p451_p8 }
  0x1a   :  { %459 = shalt.err (!%p456_p10)
}
  0x1b   :  { %s460_s1 = scalar_lea.vmem %s20_s8, 128  ;;  %p465_p12 = scmp.lt.s32.totalorder %s20_s8, %s20_s8 }
  0x1c   :  { %p461_p11 = scmp.ne.s32.totalorder %s20_s8, %s460_s1  ;;  %p466_p13 = scmp.lt.s32.totalorder %s460_s1, %s460_s1 }
  0x1e   :  { %p467_p0 = por %p466_p13, %p465_p12 }
  0x20   :  { %p468_p1 = pnand %p467_p0, %p461_p11 }
  0x22   :  { %471 = shalt.err (!%p468_p1)
}
  0x23   :  { %22 = dma.hbm_to_vmem [thread:$0]  %s637_s0, 128, %s20_s8, [#allocation3]  }
  0x24   :  { %s472_s22 = scalar_lea.hbm %s640_s3, 2048 }
  0x25   :  { %p473_p2 = scmp.ne.s32.totalorder %s640_s3, %s472_s22  ;;  %p476_p3 = scmp.lt.u32.totalorder %s472_s22, %s640_s3 }
  0x27   :  { %p478_p4 = pnand %p476_p3, %p473_p2 }
  0x29   :  { %481 = shalt.err (!%p478_p4)
}
  0x2a   :  { %s482_s27 = scalar_lea.vmem %s43_s10, 2048  ;;  %p487_p6 = scmp.lt.s32.totalorder %s43_s10, %s43_s10 }
  0x2b   :  { %p483_p5 = scmp.ne.s32.totalorder %s43_s10, %s482_s27  ;;  %p488_p7 = scmp.lt.s32.totalorder %s482_s27, %s482_s27 }
  0x2d   :  { %p489_p8 = por %p488_p7, %p487_p6 }
  0x2f   :  { %p490_p9 = pnand %p489_p8, %p483_p5 }
  0x31   :  { %493 = shalt.err (!%p490_p9)
}
  0x32   :  { %48 = dma.hbm_to_vmem [thread:$0]  %s640_s3, 2048, %s43_s10, [#allocation6], %s523_s28, %s523_s28, %s524_s29  }
  0x33   :  { %516 = dma.done.wait [#allocation3], 128  }
  0x34   :  { %517 = vsyncadd [#allocation3], 4294967168 }
  0x35   :  { %518 = dma.done.wait [#allocation6], 4096  }
  0x36   :  { %519 = vsyncadd [#allocation6], 4294963200  ;;  %v527_v0 = vmov 0.0|0.0   ;;  %vm528_vm0 = vmmov 0   ;;  %v529_v1 = vmov 0.0   ;;  %v61_v2 = vld [vmem:[#allocation5] sm:$0xff] }
  0x37   :  { %371 = vmatprep.subr.bf16.mxu0 %v527_v0  ;;  %333 = vmatprep.mubr.msk.f32.mxu0 %vm528_vm0, %v529_v1  ;;  %v62_v3 = vld [vmem:[#allocation5 + $0x8] sm:$0xff]  ;;  %v63_v4 = vld [vmem:[#allocation5 + $0x10] sm:$0xff]  ;;  %v64_v6 = vld [vmem:[#allocation5 + $0x18] sm:$0xff]  ;;  %s530_s7 = smov [#allocation8]  }
  0x38   :  { %395 = vmatprep.subr.bf16.mxu1 %v527_v0  ;;  %368 = vmatprep.mubr.msk.f32.mxu1 %vm528_vm0, %v529_v1  ;;  %v372_v5 = vpack.c.bf16 %v62_v3, %v61_v2  ;;  %v375_v7 = vpack.c.bf16 %v64_v6, %v63_v4  ;;  %v65_v8 = vld [vmem:[#allocation5 + $0x20] sm:$0xff]  ;;  %v66_v9 = vld [vmem:[#allocation5 + $0x28] sm:$0xff]  ;;  %v157_v12 = vld [vmem:[#allocation7 + $0x10] sm:$0xff]  ;;  %s255_s8 = sshll.u32 %s530_s7, 4  ;;  %s256_s8 = int_to_ptr.vmem [resolvable:$true] %s255_s8 }
  0x39   :  { %v155_v10 = vld [vmem:[#allocation7] sm:$0xff]  ;;  %v156_v11 = vld [vmem:[#allocation7 + $0x8] sm:$0xff]  ;;  %v158_v13 = vld [vmem:[#allocation7 + $0x18] sm:$0xff]  ;;  %v378_v14 = vpack.c.bf16 %v66_v9, %v65_v8  ;;  %s494_s9 = scalar_lea.vmem %s256_s8, 128  ;;  %p499_p11 = scmp.lt.s32.totalorder %s256_s8, %s256_s8 }
  0x3a   :  { %373 = vmatpush3.bf16.msra.mxu0 %v372_v5  ;;  %v396_v15 = vpack.c.bf16 %v156_v11, %v155_v10  ;;  %v67_v16 = vld [vmem:[#allocation5 + $0x30] sm:$0xff]  ;;  %v68_v17 = vld [vmem:[#allocation5 + $0x38] sm:$0xff]  ;;  %v399_v18 = vpack.c.bf16 %v158_v13, %v157_v12  ;;  %v159_v19 = vld [vmem:[#allocation7 + $0x20] sm:$0xff]  ;;  %p495_p10 = scmp.ne.s32.totalorder %s256_s8, %s494_s9  ;;  %p500_p12 = scmp.lt.s32.totalorder %s494_s9, %s494_s9 }
  0x3b   :  { %374 = vmatprep.subr.bf16.mxu0 %v527_v0  ;;  %v160_v20 = vld [vmem:[#allocation7 + $0x28] sm:$0xff]  ;;  %v381_v21 = vpack.c.bf16 %v68_v17, %v67_v16  ;;  %v69_v22 = vld [vmem:[#allocation5 + $0x40] sm:$0xff]  ;;  %v161_v25 = vld [vmem:[#allocation7 + $0x30] sm:$0xff] }
  0x3c   :  { %397 = vmatpush3.bf16.msra.mxu1 %v396_v15  ;;  %v70_v23 = vld [vmem:[#allocation5 + $0x48] sm:$0xff]  ;;  %v402_v24 = vpack.c.bf16 %v160_v20, %v159_v19  ;;  %v162_v26 = vld [vmem:[#allocation7 + $0x38] sm:$0xff]  ;;  %v71_v28 = vld [vmem:[#allocation5 + $0x50] sm:$0xff]  ;;  %p501_p13 = por %p500_p12, %p499_p11 }
  0x3d   :  { %398 = vmatprep.subr.bf16.mxu1 %v527_v0  ;;  %v384_v27 = vpack.c.bf16 %v70_v23, %v69_v22  ;;  %v72_v29 = vld [vmem:[#allocation5 + $0x58] sm:$0xff]  ;;  %v405_v30 = vpack.c.bf16 %v162_v26, %v161_v25  ;;  %v163_v31 = vld [vmem:[#allocation7 + $0x40] sm:$0xff]  ;;  %v164_v32 = vld [vmem:[#allocation7 + $0x48] sm:$0xff] }
  0x3e   :  { %376 = vmatpush3.bf16.msra.mxu0 %v375_v7  ;;  %v387_v33 = vpack.c.bf16 %v72_v29, %v71_v28  ;;  %v73_v34 = vld [vmem:[#allocation5 + $0x60] sm:$0xff]  ;;  %v74_v35 = vld [vmem:[#allocation5 + $0x68] sm:$0xff]  ;;  %v408_v36 = vpack.c.bf16 %v164_v32, %v163_v31  ;;  %v165_v37 = vld [vmem:[#allocation7 + $0x50] sm:$0xff]  ;;  %p502_p0 = pnand %p501_p13, %p495_p10 }
  0x3f   :  { %377 = vmatprep.subr.bf16.mxu0 %v527_v0  ;;  %v166_v38 = vld [vmem:[#allocation7 + $0x58] sm:$0xff]  ;;  %v390_v39 = vpack.c.bf16 %v74_v35, %v73_v34  ;;  %v75_v40 = vld [vmem:[#allocation5 + $0x70] sm:$0xff]  ;;  %v167_v43 = vld [vmem:[#allocation7 + $0x60] sm:$0xff] }
  0x40   :  { %400 = vmatpush3.bf16.msra.mxu1 %v399_v18  ;;  %v76_v41 = vld [vmem:[#allocation5 + $0x78] sm:$0xff]  ;;  %v411_v42 = vpack.c.bf16 %v166_v38, %v165_v37  ;;  %v168_v44 = vld [vmem:[#allocation7 + $0x68] sm:$0xff]  ;;  %v169_v48 = vld [vmem:[#allocation7 + $0x70] sm:$0xff] }
  0x41   :  { %401 = vmatprep.subr.bf16.mxu1 %v527_v0  ;;  %v393_v45 = vpack.c.bf16 %v76_v41, %v75_v40  ;;  %v414_v46 = vpack.c.bf16 %v168_v44, %v167_v43  ;;  %v60_v47 = vld [vmem:[#allocation2] sm:$0xff] }
  0x42   :  { %379 = vmatpush3.bf16.msra.mxu0 %v378_v14  ;;  %v170_v49 = vld [vmem:[#allocation7 + $0x78] sm:$0xff] }
  0x43   :  { %380 = vmatprep.subr.bf16.mxu0 %v527_v0  ;;  %v417_v50 = vpack.c.bf16 %v170_v49, %v169_v48  ;;  %v265_v51 = vld [vmem:[%s639_s2] ss:$0 sm:$0xff] }
  0x44   :  { %403 = vmatpush3.bf16.msra.mxu1 %v402_v24  ;;  %v266_v56 = vld [vmem:[%s641_s4] ss:$0 sm:$0xff] }
  0x45   :  { %404 = vmatprep.subr.bf16.mxu1 %v527_v0 }
  0x46   :  { %382 = vmatpush3.bf16.msra.mxu0 %v381_v21 }
  0x47   :  { %383 = vmatprep.subr.bf16.mxu0 %v527_v0 }
  0x48   :  { %406 = vmatpush3.bf16.msra.mxu1 %v405_v30 }
  0x49   :  { %407 = vmatprep.subr.bf16.mxu1 %v527_v0 }
  0x4a   :  { %385 = vmatpush3.bf16.msra.mxu0 %v384_v27 }
  0x4b   :  { %386 = vmatprep.subr.bf16.mxu0 %v527_v0 }
  0x4c   :  { %409 = vmatpush3.bf16.msra.mxu1 %v408_v36 }
  0x4d   :  { %410 = vmatprep.subr.bf16.mxu1 %v527_v0 }
  0x4e   :  { %388 = vmatpush3.bf16.msra.mxu0 %v387_v33 }
  0x4f   :  { %389 = vmatprep.subr.bf16.mxu0 %v527_v0 }
  0x50   :  { %412 = vmatpush3.bf16.msra.mxu1 %v411_v42 }
  0x51   :  { %413 = vmatprep.subr.bf16.mxu1 %v527_v0 }
  0x52   :  { %391 = vmatpush3.bf16.msra.mxu0 %v390_v39 }
  0x53   :  { %392 = vmatprep.subr.bf16.mxu0 %v527_v0 }
  0x54   :  { %415 = vmatpush3.bf16.msra.mxu1 %v414_v46 }
  0x55   :  { %416 = vmatprep.subr.bf16.mxu1 %v527_v0 }
  0x56   :  { %394 = vmatpush3.bf16.msra.mxu0 %v393_v45 }
  0x58   :  { %418 = vmatpush3.bf16.msra.mxu1 %v417_v50 }
  0x59   :  { %334 = vmatmul.mubr.f32.vlgmr.msra.gmra.mrb[0].mxu0 %v60_v47 }
 0x12c   :  { %v150_v52 = vpop.f32.mrb[0].mxu0 }
 0x12d   :  { %v151_v53 = vadd.f32 %v265_v51, %v150_v52  ;;  %v335_v54 = vpop.f32.mrb[1].mxu0 }
 0x12f   :  { %v154_v55 = vmax.f32 %v151_v53, 0.0 }
 0x131   :  { %369 = vmatmul.mubr.f32.vlgmr.msra.gmra.mrb[0].mxu1 %v154_v55 }
 0x204   :  { %v244_v57 = vpop.f32.mrb[0].mxu1 }
 0x205   :  { %v245_v58 = vadd.f32 %v266_v56, %v244_v57  ;;  %v370_v59 = vpop.f32.mrb[1].mxu1 }
 0x207   :  { %248 = vst [vmem:[#allocation8] sm:$0xff] %v245_v58 }
 0x208   :  { %505 = shalt.err (!%p502_p0)
}
 0x209   :  { %s506_s11 = scalar_lea.hbm %s642_s5, 128 }
 0x20a   :  { %p507_p1 = scmp.ne.s32.totalorder %s642_s5, %s506_s11  ;;  %p510_p2 = scmp.lt.u32.totalorder %s506_s11, %s642_s5 }
 0x20c   :  { %p512_p3 = pnand %p510_p2, %p507_p1 }
 0x20e   :  { %515 = shalt.err (!%p512_p3)
}
 0x20f   :  { %258 = dma.vmem_to_hbm [thread:$0]  %s256_s8, 128, %s642_s5, [#allocation4]  }
 0x210   :  { %520 = dma.done.wait [#allocation4], 128  }
 0x211   :  { %521 = vsyncadd [#allocation4], 4294967168 }
 0x212   :  { %262 = vsyncpa [#allocation3], 1 }
 0x213   :  { %263 = vsyncpa [#allocation6], 1 }
 0x214   :  { %264 = vsyncpa [#allocation4], 1 }

</bundles_post_ra>
